<compile_context>
chip_gen: v6e
topology: v6e:2x2x1
jax: 0.10.0
libtpu: 0.0.40
codegen_flags: <defaults>
</compile_context>

<pallas_src>
import math

import jax
import jax.numpy as jnp
from jax.experimental import pallas as pl
from jax.experimental.pallas import tpu as pltpu


def _broadcast_kernel(mem_ref, out_ref):
    # mem_ref: (1, F)  resident token slab, F = num_tokens * dim (lane-dense)
    # out_ref: (BT, F) output tile for the current batch tile
    out_ref[...] = jnp.broadcast_to(mem_ref[...], out_ref.shape)


def persistent_memory_forward(memory_tokens: jax.Array,
                              batch_size=None,
                              *,
                              target_tile_bytes: int = 4 * 1024 * 1024):
    """Equivalent of PersistentMemory.forward.

    Args:
        memory_tokens: [num_tokens, dim] parameter array.
        batch_size: optional int. If given, returns a materialized
            [batch_size, num_tokens, dim] broadcast of the tokens; otherwise
            returns the tokens unchanged.
        target_tile_bytes: approximate per-tile output size (sized so the
            double-buffered tile stays well under v7x's 32 MiB scoped VMEM).
    """
    if batch_size is None:
        # No batch expansion requested: identical to returning the parameter.
        return memory_tokens

    num_tokens, dim = memory_tokens.shape
    feat = num_tokens * dim
    itemsize = jnp.dtype(memory_tokens.dtype).itemsize

    # Lane-dense layout: last (lane) dim is the full flattened token slab.
    mem_flat = memory_tokens.reshape(1, feat)

    # --- Batch tile sizing -------------------------------------------------
    # Aim for a few MiB per output tile so per-grid-step overhead (~0.35 us) is
    # amortized, while 2 * BT * feat * itemsize (double-buffered output) plus
    # the small resident input stays far below the 32 MiB scoped-VMEM default.
    row_bytes = feat * itemsize
    bt = max(1, target_tile_bytes // row_bytes)
    if bt >= batch_size:
        bt = batch_size                       # full batch in one tile
    else:
        bt = max(8, (bt // 8) * 8)            # keep sublane dim a multiple of 8
        bt = min(bt, batch_size)

    grid = (pl.cdiv(batch_size, bt),)

    out_flat = pl.pallas_call(
        _broadcast_kernel,
        out_shape=jax.ShapeDtypeStruct((batch_size, feat), memory_tokens.dtype),
        grid_spec=pl.GridSpec(
            grid=grid,
            in_specs=[
                # Same block index for every grid step -> token slab stays
                # resident in VMEM (no per-step re-fetch).
                pl.BlockSpec((1, feat), lambda i: (0, 0)),
            ],
            out_specs=pl.BlockSpec((bt, feat), lambda i: (i, 0)),
        ),
        compiler_params=pltpu.CompilerParams(
            # Store-bound grid axis: let v7x's two TensorCores split the writes.
            dimension_semantics=("parallel",),
        ),
    )(mem_flat)

    # Contiguous (free) reshape back to [batch, num_tokens, dim].
    return out_flat.reshape(batch_size, num_tokens, dim)


def init_persistent_memory(key, num_tokens: int, dim: int,
                           dtype=jnp.float32) -> jax.Array:
    """Mirrors PersistentMemory._init_parameters:
    normal(mean=0, std=sqrt(2 / (num_tokens + dim)))."""
    std = math.sqrt(2.0 / (num_tokens + dim))
    return std * jax.random.normal(key, (num_tokens, dim), dtype=dtype)


if __name__ == "__main__":
    key = jax.random.PRNGKey(0)
    num_tokens, dim, batch = 8, 32, 2

    memory_tokens = init_persistent_memory(key, num_tokens, dim)

    # Batched path: Pallas kernel materializes the broadcast over batch.
    out = persistent_memory_forward(memory_tokens, batch_size=batch)
    out = jax.block_until_ready(out)
    assert out.shape == (batch, num_tokens, dim), out.shape

    ref = jnp.broadcast_to(memory_tokens[None, :, :], (batch, num_tokens, dim))
    assert jnp.allclose(out, ref), "mismatch vs reference broadcast"

    # Exercise the multi-tile path (batch split across several grid steps) at
    # small shapes by shrinking the target tile size.
    batch_big = 16
    out_big = persistent_memory_forward(memory_tokens, batch_size=batch_big,
                                        target_tile_bytes=8 * 1024)
    out_big = jax.block_until_ready(out_big)
    ref_big = jnp.broadcast_to(memory_tokens[None, :, :],
                               (batch_big, num_tokens, dim))
    assert out_big.shape == (batch_big, num_tokens, dim)
    assert jnp.allclose(out_big, ref_big), "mismatch vs reference (tiled batch)"

    # Unbatched path (returns the parameter as-is).
    out2 = jax.block_until_ready(persistent_memory_forward(memory_tokens))
    assert out2.shape == (num_tokens, dim)
    assert jnp.allclose(out2, memory_tokens)

    print("KERNEL_OK")
</pallas_src>

<mosaic_0001>
module attributes {stable_mosaic.version = 11 : i64} {
  func.func @_broadcast_kernel(%arg0: i32, %arg1: memref<1x256xf32, #tpu.memory_space<vmem>>, %arg2: memref<2x256xf32, #tpu.memory_space<vmem>>) attributes {dimension_semantics = [#tpu.dimension_semantics<parallel>], iteration_bounds = array<i64: 1>, scalar_prefetch = 0 : i64, scratch_operands = 0 : i64, tpu.core_type = #tpu.core_type<tc>, window_params = [{pipeline_mode = #tpu.pipeline_mode<synchronous>, transform_indices = @transform_0, window_bounds = array<i64: 1, 256>}, {transform_indices = @transform_1, window_bounds = array<i64: 2, 256>}]} {
    %c0 = arith.constant 0 : index
    %c0_0 = arith.constant 0 : index
    %0 = vector.load %arg1[%c0, %c0_0] : memref<1x256xf32, #tpu.memory_space<vmem>>, vector<1x256xf32>
    %1 = vector.shape_cast %0 : vector<1x256xf32> to vector<1x256xf32>
    %2 = vector.broadcast %1 : vector<1x256xf32> to vector<2x256xf32>
    %c0_1 = arith.constant 0 : index
    %c0_2 = arith.constant 0 : index
    %3 = vector.load %arg2[%c0_1, %c0_2] : memref<2x256xf32, #tpu.memory_space<vmem>>, vector<2x256xf32>
    tpu.vector_store %arg2[%c0_1, %c0_2], %2 {strides = array<i32>} : memref<2x256xf32, #tpu.memory_space<vmem>>, vector<2x256xf32>,
    return
  }
  func.func @transform_0(%arg0: i32) -> (i32, i32) {
    %c0_i32 = arith.constant 0 : i32
    %c0_i32_0 = arith.constant 0 : i32
    %c0_i32_1 = arith.constant 0 : i32
    return %c0_i32, %c0_i32_0 : i32, i32
  }
  func.func @transform_1(%arg0: i32) -> (i32, i32) {
    %c0_i32 = arith.constant 0 : i32
    %c0_i32_0 = arith.constant 0 : i32
    return %arg0, %c0_i32 : i32, i32
  }
}

</mosaic_0001>

<bundles_post_ra>
// kernel: tpu_custom_call.1
= control target key start
LH: loop header
LB: loop body
LE: loop exit
PB: predicated region body
PF: predicated region fallthrough
CT: control target
= control target key end

     0   :  { %6 = vsyncpa [#allocation3], 0  ;;  %s121_s0 = inlined_call_operand.hbm [shape: f32[1,256], index: 0, kind: input, shape index: {}]   ;;  %s122_s1 = inlined_call_operand.hbm [shape: f32[2,256], index: 1, kind: output, shape index: {}]  }
   0x1   :  { %7 = vsyncpa [#allocation4], 0  ;;  %s103_s6 = smov [#allocation2]  }
   0x2   :  { %s14_s7 = sshll.u32 %s103_s6, 4  ;;  %s15_s7 = int_to_ptr.vmem [resolvable:$true] %s14_s7 }
   0x3   :  { %s67_s8 = scalar_lea.vmem %s15_s7, 32  ;;  %p72_p1 = scmp.lt.s32.totalorder %s15_s7, %s15_s7 }
   0x4   :  { %p68_p0 = scmp.ne.s32.totalorder %s15_s7, %s67_s8  ;;  %p73_p2 = scmp.lt.s32.totalorder %s67_s8, %s67_s8 }
   0x6   :  { %p74_p3 = por %p73_p2, %p72_p1 }
   0x8   :  { %p75_p4 = pnand %p74_p3, %p68_p0 }
   0xa   :  { %78 = shalt.err (!%p75_p4)
}
   0xb   :  { %17 = dma.hbm_to_vmem [thread:$0]  %s121_s0, 32, %s15_s7, [#allocation3]  }
   0xc   :  { %99 = dma.done.wait [#allocation3], 32  }
   0xd   :  { %100 = vsyncadd [#allocation3], 4294967264  ;;  %v23_v0 = vlaneseq  ;;  %v21_v4 = vld [vmem:[#allocation2] sm:$0x3]  ;;  %s104_s11 = smov [#allocation5]  }
   0xe   :  { %s47_s12 = sshll.u32 %s104_s11, 4  ;;  %s48_s12 = int_to_ptr.vmem [resolvable:$true] %s47_s12 }
   0xf   :  { %v24_v1 = vshrl.u32 %v23_v0, 7  ;;  %s79_s13 = scalar_lea.vmem %s48_s12, 64  ;;  %p84_p6 = scmp.lt.s32.totalorder %s48_s12, %s48_s12 }
  0x10   :  { %p80_p5 = scmp.ne.s32.totalorder %s48_s12, %s79_s13  ;;  %p85_p7 = scmp.lt.s32.totalorder %s79_s13, %s79_s13 }
  0x11   :  { %v25_v2 = vsub.s32 0, %v24_v1  ;;  %v29_v3 = vsub.s32 1, %v24_v1 }
  0x12   :  { %p86_p8 = por %p85_p7, %p84_p6 }
  0x13   :  { %v26_v5 = vrot.slane %v21_v4, %v25_v2  ;;  %v30_v6 = vrot.slane %v21_v4, %v29_v3 }
  0x14   :  { %p87_p9 = pnand %p86_p8, %p80_p5 }
  0x15   :  { %v31_v7 = vcombine.low %v26_v5, %v30_v6 }
  0x17   :  { %56 = vst.sshfl [vmem:[#allocation5] sm:$0x33 pattern:$0x76325410] %v31_v7 }
  0x18   :  { %90 = shalt.err (!%p87_p9)
}
  0x19   :  { %50 = dma.vmem_to_hbm [thread:$0]  %s48_s12, 64, %s122_s1, [#allocation4]  }
  0x1a   :  { %101 = dma.done.wait [#allocation4], 64  }
  0x1b   :  { %102 = vsyncadd [#allocation4], 4294967232 }
  0x1c   :  { %54 = vsyncpa [#allocation3], 1 }
  0x1d   :  { %55 = vsyncpa [#allocation4], 1 }

</bundles_post_ra>
